<compile_context>
chip_gen: v7x
topology: tpu7x:2x2x1
jax: 0.10.0
libtpu: 0.0.40
codegen_flags: <defaults>
</compile_context>

<pallas_src>
import functools

import jax
import jax.numpy as jnp
from jax.experimental import pallas as pl
from jax.experimental.pallas import tpu as pltpu


def _conv_bn_relu_kernel(w_ref, b_ref, row_ref, col_ref, x_ref, o_ref, *,
                         H, W, K, nb):
    """Fused KxK conv (1 input channel) + folded BN + ReLU for `nb` images.

    w_ref:   (C, K*K) f32   conv taps with the BN scale folded in
    b_ref:   (C, 1)   f32   folded BN bias (f32 epilogue add)
    row_ref: (1, H*W) i32   row index of each flattened pixel
    col_ref: (1, H*W) i32   col index of each flattened pixel
    x_ref:   (nb, 1, H*W)   input images (any float dtype; upcast to f32)
    o_ref:   (nb, C, H*W)   lane-dense output slabs
    """
    HW = H * W
    r = K // 2
    w = w_ref[...]
    bias = b_ref[...]
    row = row_ref[...]
    col = col_ref[...]

    # Per-tap (lane shift, boundary mask), hoisted out of the per-image loop.
    taps = []
    for t in range(K * K):
        dy, dx = t // K - r, t % K - r
        shift = (dy * W + dx) % HW          # tap[j] = x[j + dy*W + dx]
        conds = []
        if dy < 0:
            conds.append(row >= -dy)
        if dy > 0:
            conds.append(row <= H - 1 - dy)
        if dx < 0:
            conds.append(col >= -dx)
        if dx > 0:
            conds.append(col <= W - 1 - dx)
        mask = None
        for cond in conds:
            mask = cond if mask is None else jnp.logical_and(mask, cond)
        taps.append((t, shift, mask))

    for b in range(nb):                     # static unroll; nb is small
        xb = x_ref[b].astype(jnp.float32)   # (1, HW)
        acc = jnp.zeros((w.shape[0], HW), jnp.float32)
        for t, shift, mask in taps:
            if shift == 0:
                tap = xb
            else:
                # lane rotation via two static slices; wrapped lanes get masked
                tap = jnp.concatenate([xb[:, shift:], xb[:, :shift]], axis=1)
            if mask is not None:
                tap = jnp.where(mask, tap, 0.0)   # zero-padding semantics
            acc = acc + w[:, t:t + 1] * tap       # (C,1)*(1,HW) VPU FMA
        o_ref[b] = jnp.maximum(acc + bias, 0.0).astype(o_ref.dtype)


def _pick_batch_block(n, per_image_bytes):
    """Images per grid step: amortize per-step overhead, keep >=2 parallel steps."""
    if n < 2:
        return 1
    budget = 4 << 20                         # ~4 MiB of blocks per step (pre double-buffer)
    nb = max(1, min(n // 2, budget // max(per_image_bytes, 1)))
    while n % nb:                            # must divide the batch
        nb -= 1
    return nb


def resnet_layer_forward(x, conv_w, bn_gamma, bn_beta, bn_mean, bn_var,
                         eps=1e-5, batch_block=None, out_dtype=None):
    """ResNetLayer forward, conv_first=True path (Conv2d -> BatchNorm2d -> ReLU).

    x: (N, 1, H, W); conv_w: (C, 1, K, K); BN params: (C,). Stride must be 1.
    """
    N, Cin, H, W = x.shape
    assert Cin == 1, "conv_first=True path uses a single input channel"
    C, _, Kh, Kw = conv_w.shape
    assert Kh == Kw and Kh % 2 == 1, "square odd kernel expected"
    K = Kh
    HW = H * W
    if out_dtype is None:
        out_dtype = x.dtype                  # pass jnp.bfloat16 to halve the output stream

    # Fold eval-mode BN into a per-channel weight scale + a separate f32 bias.
    scale = bn_gamma / jnp.sqrt(bn_var + eps)                           # (C,)
    w_folded = (conv_w[:, 0].reshape(C, K * K) * scale[:, None]).astype(jnp.float32)
    bias = (bn_beta - bn_mean * scale).reshape(C, 1).astype(jnp.float32)

    # Flattened view of the image (free reshape; kernel reads x exactly once).
    x_flat = x.reshape(N, 1, HW)

    # Row/col index of each flattened pixel (tiny constants for boundary masks;
    # computed here so the kernel needs no in-kernel integer div/mod).
    pos = jnp.arange(HW, dtype=jnp.int32).reshape(1, HW)
    row_idx = pos // W
    col_idx = pos % W

    in_bytes = HW * x.dtype.itemsize
    out_bytes = C * HW * jnp.dtype(out_dtype).itemsize
    nb = batch_block if batch_block is not None else _pick_batch_block(N, in_bytes + out_bytes)
    assert N % nb == 0, "batch_block must divide N"

    # Explicit scoped-VMEM budget: double-buffered in/out blocks + constants,
    # with headroom; capped at 64 MiB so it also fits v7x physical VMEM.
    block_bytes = nb * (in_bytes + out_bytes)
    const_bytes = (C * K * K + C + 2 * HW) * 4
    vmem_limit = int(min(64 << 20,
                         max(8 << 20, 4 * block_bytes + 2 * const_bytes + (1 << 20))))

    out = pl.pallas_call(
        functools.partial(_conv_bn_relu_kernel, H=H, W=W, K=K, nb=nb),
        out_shape=jax.ShapeDtypeStruct((N, C, HW), out_dtype),
        grid_spec=pl.GridSpec(
            grid=(N // nb,),
            in_specs=[
                pl.BlockSpec((C, K * K), lambda i: (0, 0)),
                pl.BlockSpec((C, 1), lambda i: (0, 0)),
                pl.BlockSpec((1, HW), lambda i: (0, 0)),
                pl.BlockSpec((1, HW), lambda i: (0, 0)),
                pl.BlockSpec((nb, 1, HW), lambda i: (i, 0, 0)),
            ],
            out_specs=pl.BlockSpec((nb, C, HW), lambda i: (i, 0, 0)),
        ),
        compiler_params=pltpu.CompilerParams(
            dimension_semantics=("parallel",),   # >=2 steps -> v7x megacore splits batch
            vmem_limit_bytes=vmem_limit,
        ),
    )(w_folded, bias, row_idx, col_idx, x_flat)

    # NOTE: if H*W is not a multiple of 128 (e.g. 28x28) the stores become
    # masked vst.msk -- still correct, just slower.
    return out.reshape(N, C, H, W)


def _reference(x, conv_w, bn_gamma, bn_beta, bn_mean, bn_var, eps=1e-5):
    y = jax.lax.conv_general_dilated(
        x, conv_w, window_strides=(1, 1), padding="SAME",
        dimension_numbers=("NCHW", "OIHW", "NCHW"),
        precision=jax.lax.Precision.HIGHEST)
    inv = 1.0 / jnp.sqrt(bn_var + eps)
    y = (y - bn_mean[None, :, None, None]) * inv[None, :, None, None]
    y = y * bn_gamma[None, :, None, None] + bn_beta[None, :, None, None]
    return jnp.maximum(y, 0.0)


if __name__ == "__main__":
    # Small shapes consistent with the module defaults:
    #   conv_first=True path (single input channel), num_filters=16, k=3, s=1.
    N, H, W = 4, 16, 16
    C = 16   # num_filters
    K = 3

    key = jax.random.PRNGKey(0)
    kx, kw, kg, kb, km, kv = jax.random.split(key, 6)

    x = jax.random.normal(kx, (N, 1, H, W), dtype=jnp.float32)
    conv_w = 0.1 * jax.random.normal(kw, (C, 1, K, K), dtype=jnp.float32)
    bn_gamma = 1.0 + 0.05 * jax.random.normal(kg, (C,), dtype=jnp.float32)
    bn_beta = 0.05 * jax.random.normal(kb, (C,), dtype=jnp.float32)
    bn_mean = 0.05 * jax.random.normal(km, (C,), dtype=jnp.float32)
    bn_var = 1.0 + 0.05 * jax.random.uniform(kv, (C,), dtype=jnp.float32)

    out = resnet_layer_forward(x, conv_w, bn_gamma, bn_beta, bn_mean, bn_var)
    out = jax.block_until_ready(out)

    ref = _reference(x, conv_w, bn_gamma, bn_beta, bn_mean, bn_var)
    assert out.shape == (N, C, H, W)
    err = jnp.max(jnp.abs(out - ref))
    # All-f32 VPU accumulation vs an f32 HIGHEST-precision reference: only
    # summation-order / BN-folding rounding remains.
    assert jnp.allclose(out, ref, atol=1e-4, rtol=1e-4), f"max abs err = {err}"

    print("KERNEL_OK")
</pallas_src>

<mosaic_0001>
module attributes {stable_mosaic.version = 11 : i64} {
  func.func @_conv_bn_relu_kernel(%arg0: i32, %arg1: memref<16x9xf32, #tpu.memory_space<vmem>>, %arg2: memref<16x1xf32, #tpu.memory_space<vmem>>, %arg3: memref<1x256xi32, #tpu.memory_space<vmem>>, %arg4: memref<1x256xi32, #tpu.memory_space<vmem>>, %arg5: memref<2x1x256xf32, #tpu.memory_space<vmem>>, %arg6: memref<2x16x256xf32, #tpu.memory_space<vmem>>) attributes {dimension_semantics = [#tpu.dimension_semantics<parallel>], iteration_bounds = array<i64: 2>, scalar_prefetch = 0 : i64, scratch_operands = 0 : i64, tpu.core_type = #tpu.core_type<tc>, window_params = [{pipeline_mode = #tpu.pipeline_mode<synchronous>, transform_indices = @transform_0, window_bounds = array<i64: 16, 9>}, {pipeline_mode = #tpu.pipeline_mode<synchronous>, transform_indices = @transform_1, window_bounds = array<i64: 16, 1>}, {pipeline_mode = #tpu.pipeline_mode<synchronous>, transform_indices = @transform_2, window_bounds = array<i64: 1, 256>}, {pipeline_mode = #tpu.pipeline_mode<synchronous>, transform_indices = @transform_3, window_bounds = array<i64: 1, 256>}, {transform_indices = @transform_4, window_bounds = array<i64: 2, 1, 256>}, {transform_indices = @transform_5, window_bounds = array<i64: 2, 16, 256>}]} {
    %c0 = arith.constant 0 : index
    %c0_0 = arith.constant 0 : index
    %0 = vector.load %arg1[%c0, %c0_0] : memref<16x9xf32, #tpu.memory_space<vmem>>, vector<16x9xf32>
    %c0_1 = arith.constant 0 : index
    %c0_2 = arith.constant 0 : index
    %1 = vector.load %arg2[%c0_1, %c0_2] : memref<16x1xf32, #tpu.memory_space<vmem>>, vector<16x1xf32>
    %c0_3 = arith.constant 0 : index
    %c0_4 = arith.constant 0 : index
    %2 = vector.load %arg3[%c0_3, %c0_4] : memref<1x256xi32, #tpu.memory_space<vmem>>, vector<1x256xi32>
    %c0_5 = arith.constant 0 : index
    %c0_6 = arith.constant 0 : index
    %3 = vector.load %arg4[%c0_5, %c0_6] : memref<1x256xi32, #tpu.memory_space<vmem>>, vector<1x256xi32>
    %c1_i32 = arith.constant 1 : i32
    %4 = vector.broadcast %c1_i32 : i32 to vector<1x256xi32>
    %5 = arith.cmpi sge, %2, %4 : vector<1x256xi32>
    %c1_i32_7 = arith.constant 1 : i32
    %6 = vector.broadcast %c1_i32_7 : i32 to vector<1x256xi32>
    %7 = arith.cmpi sge, %3, %6 : vector<1x256xi32>
    %8 = arith.andi %5, %7 : vector<1x256xi1>
    %c1_i32_8 = arith.constant 1 : i32
    %9 = vector.broadcast %c1_i32_8 : i32 to vector<1x256xi32>
    %10 = arith.cmpi sge, %2, %9 : vector<1x256xi32>
    %c1_i32_9 = arith.constant 1 : i32
    %11 = vector.broadcast %c1_i32_9 : i32 to vector<1x256xi32>
    %12 = arith.cmpi sge, %2, %11 : vector<1x256xi32>
    %c14_i32 = arith.constant 14 : i32
    %13 = vector.broadcast %c14_i32 : i32 to vector<1x256xi32>
    %14 = arith.cmpi sle, %3, %13 : vector<1x256xi32>
    %15 = arith.andi %12, %14 : vector<1x256xi1>
    %c1_i32_10 = arith.constant 1 : i32
    %16 = vector.broadcast %c1_i32_10 : i32 to vector<1x256xi32>
    %17 = arith.cmpi sge, %3, %16 : vector<1x256xi32>
    %c14_i32_11 = arith.constant 14 : i32
    %18 = vector.broadcast %c14_i32_11 : i32 to vector<1x256xi32>
    %19 = arith.cmpi sle, %3, %18 : vector<1x256xi32>
    %c14_i32_12 = arith.constant 14 : i32
    %20 = vector.broadcast %c14_i32_12 : i32 to vector<1x256xi32>
    %21 = arith.cmpi sle, %2, %20 : vector<1x256xi32>
    %c1_i32_13 = arith.constant 1 : i32
    %22 = vector.broadcast %c1_i32_13 : i32 to vector<1x256xi32>
    %23 = arith.cmpi sge, %3, %22 : vector<1x256xi32>
    %24 = arith.andi %21, %23 : vector<1x256xi1>
    %c14_i32_14 = arith.constant 14 : i32
    %25 = vector.broadcast %c14_i32_14 : i32 to vector<1x256xi32>
    %26 = arith.cmpi sle, %2, %25 : vector<1x256xi32>
    %c14_i32_15 = arith.constant 14 : i32
    %27 = vector.broadcast %c14_i32_15 : i32 to vector<1x256xi32>
    %28 = arith.cmpi sle, %2, %27 : vector<1x256xi32>
    %c14_i32_16 = arith.constant 14 : i32
    %29 = vector.broadcast %c14_i32_16 : i32 to vector<1x256xi32>
    %30 = arith.cmpi sle, %3, %29 : vector<1x256xi32>
    %31 = arith.andi %28, %30 : vector<1x256xi1>
    %c0_17 = arith.constant 0 : index
    %c0_18 = arith.constant 0 : index
    %c0_19 = arith.constant 0 : index
    %32 = vector.load %arg5[%c0_17, %c0_18, %c0_19] : memref<2x1x256xf32, #tpu.memory_space<vmem>>, vector<1x1x256xf32>
    %33 = vector.shape_cast %32 : vector<1x1x256xf32> to vector<1x256xf32>
    %cst = arith.constant 0.000000e+00 : f32
    %34 = vector.broadcast %cst : f32 to vector<16x256xf32>
    %35 = vector.extract_strided_slice %33 {offsets = [0, 239], sizes = [1, 17], strides = [1, 1]} : vector<1x256xf32> to vector<1x17xf32>
    %36 = vector.extract_strided_slice %33 {offsets = [0, 0], sizes = [1, 239], strides = [1, 1]} : vector<1x256xf32> to vector<1x239xf32>
    %37 = tpu.concatenate %35, %36 in 1 : vector<1x17xf32>, vector<1x239xf32> -> vector<1x256xf32>
    %cst_20 = arith.constant 0.000000e+00 : f32
    %38 = vector.broadcast %cst_20 : f32 to vector<1x256xf32>
    %39 = arith.select %8, %37, %38 : vector<1x256xi1>, vector<1x256xf32>
    %40 = vector.extract_strided_slice %0 {offsets = [0, 0], sizes = [16, 1], strides = [1, 1]} : vector<16x9xf32> to vector<16x1xf32>
    %41 = vector.broadcast %40 : vector<16x1xf32> to vector<16x256xf32>
    %42 = vector.broadcast %39 : vector<1x256xf32> to vector<16x256xf32>
    %43 = arith.mulf %41, %42 : vector<16x256xf32>
    %44 = arith.addf %34, %43 : vector<16x256xf32>
    %45 = vector.extract_strided_slice %33 {offsets = [0, 240], sizes = [1, 16], strides = [1, 1]} : vector<1x256xf32> to vector<1x16xf32>
    %46 = vector.extract_strided_slice %33 {offsets = [0, 0], sizes = [1, 240], strides = [1, 1]} : vector<1x256xf32> to vector<1x240xf32>
    %47 = tpu.concatenate %45, %46 in 1 : vector<1x16xf32>, vector<1x240xf32> -> vector<1x256xf32>
    %cst_21 = arith.constant 0.000000e+00 : f32
    %48 = vector.broadcast %cst_21 : f32 to vector<1x256xf32>
    %49 = arith.select %10, %47, %48 : vector<1x256xi1>, vector<1x256xf32>
    %50 = vector.extract_strided_slice %0 {offsets = [0, 1], sizes = [16, 1], strides = [1, 1]} : vector<16x9xf32> to vector<16x1xf32>
    %51 = vector.broadcast %50 : vector<16x1xf32> to vector<16x256xf32>
    %52 = vector.broadcast %49 : vector<1x256xf32> to vector<16x256xf32>
    %53 = arith.mulf %51, %52 : vector<16x256xf32>
    %54 = arith.addf %44, %53 : vector<16x256xf32>
    %55 = vector.extract_strided_slice %33 {offsets = [0, 241], sizes = [1, 15], strides = [1, 1]} : vector<1x256xf32> to vector<1x15xf32>
    %56 = vector.extract_strided_slice %33 {offsets = [0, 0], sizes = [1, 241], strides = [1, 1]} : vector<1x256xf32> to vector<1x241xf32>
    %57 = tpu.concatenate %55, %56 in 1 : vector<1x15xf32>, vector<1x241xf32> -> vector<1x256xf32>
    %cst_22 = arith.constant 0.000000e+00 : f32
    %58 = vector.broadcast %cst_22 : f32 to vector<1x256xf32>
    %59 = arith.select %15, %57, %58 : vector<1x256xi1>, vector<1x256xf32>
    %60 = vector.extract_strided_slice %0 {offsets = [0, 2], sizes = [16, 1], strides = [1, 1]} : vector<16x9xf32> to vector<16x1xf32>
    %61 = vector.broadcast %60 : vector<16x1xf32> to vector<16x256xf32>
    %62 = vector.broadcast %59 : vector<1x256xf32> to vector<16x256xf32>
    %63 = arith.mulf %61, %62 : vector<16x256xf32>
    %64 = arith.addf %54, %63 : vector<16x256xf32>
    %65 = vector.extract_strided_slice %33 {offsets = [0, 255], sizes = [1, 1], strides = [1, 1]} : vector<1x256xf32> to vector<1x1xf32>
    %66 = vector.extract_strided_slice %33 {offsets = [0, 0], sizes = [1, 255], strides = [1, 1]} : vector<1x256xf32> to vector<1x255xf32>
    %67 = tpu.concatenate %65, %66 in 1 : vector<1x1xf32>, vector<1x255xf32> -> vector<1x256xf32>
    %cst_23 = arith.constant 0.000000e+00 : f32
    %68 = vector.broadcast %cst_23 : f32 to vector<1x256xf32>
    %69 = arith.select %17, %67, %68 : vector<1x256xi1>, vector<1x256xf32>
    %70 = vector.extract_strided_slice %0 {offsets = [0, 3], sizes = [16, 1], strides = [1, 1]} : vector<16x9xf32> to vector<16x1xf32>
    %71 = vector.broadcast %70 : vector<16x1xf32> to vector<16x256xf32>
    %72 = vector.broadcast %69 : vector<1x256xf32> to vector<16x256xf32>
    %73 = arith.mulf %71, %72 : vector<16x256xf32>
    %74 = arith.addf %64, %73 : vector<16x256xf32>
    %75 = vector.extract_strided_slice %0 {offsets = [0, 4], sizes = [16, 1], strides = [1, 1]} : vector<16x9xf32> to vector<16x1xf32>
    %76 = vector.broadcast %75 : vector<16x1xf32> to vector<16x256xf32>
    %77 = vector.broadcast %33 : vector<1x256xf32> to vector<16x256xf32>
    %78 = arith.mulf %76, %77 : vector<16x256xf32>
    %79 = arith.addf %74, %78 : vector<16x256xf32>
    %80 = vector.extract_strided_slice %33 {offsets = [0, 1], sizes = [1, 255], strides = [1, 1]} : vector<1x256xf32> to vector<1x255xf32>
    %81 = vector.extract_strided_slice %33 {offsets = [0, 0], sizes = [1, 1], strides = [1, 1]} : vector<1x256xf32> to vector<1x1xf32>
    %82 = tpu.concatenate %80, %81 in 1 : vector<1x255xf32>, vector<1x1xf32> -> vector<1x256xf32>
    %cst_24 = arith.constant 0.000000e+00 : f32
    %83 = vector.broadcast %cst_24 : f32 to vector<1x256xf32>
    %84 = arith.select %19, %82, %83 : vector<1x256xi1>, vector<1x256xf32>
    %85 = vector.extract_strided_slice %0 {offsets = [0, 5], sizes = [16, 1], strides = [1, 1]} : vector<16x9xf32> to vector<16x1xf32>
    %86 = vector.broadcast %85 : vector<16x1xf32> to vector<16x256xf32>
    %87 = vector.broadcast %84 : vector<1x256xf32> to vector<16x256xf32>
    %88 = arith.mulf %86, %87 : vector<16x256xf32>
    %89 = arith.addf %79, %88 : vector<16x256xf32>
    %90 = vector.extract_strided_slice %33 {offsets = [0, 15], sizes = [1, 241], strides = [1, 1]} : vector<1x256xf32> to vector<1x241xf32>
    %91 = vector.extract_strided_slice %33 {offsets = [0, 0], sizes = [1, 15], strides = [1, 1]} : vector<1x256xf32> to vector<1x15xf32>
    %92 = tpu.concatenate %90, %91 in 1 : vector<1x241xf32>, vector<1x15xf32> -> vector<1x256xf32>
    %cst_25 = arith.constant 0.000000e+00 : f32
    %93 = vector.broadcast %cst_25 : f32 to vector<1x256xf32>
    %94 = arith.select %24, %92, %93 : vector<1x256xi1>, vector<1x256xf32>
    %95 = vector.extract_strided_slice %0 {offsets = [0, 6], sizes = [16, 1], strides = [1, 1]} : vector<16x9xf32> to vector<16x1xf32>
    %96 = vector.broadcast %95 : vector<16x1xf32> to vector<16x256xf32>
    %97 = vector.broadcast %94 : vector<1x256xf32> to vector<16x256xf32>
    %98 = arith.mulf %96, %97 : vector<16x256xf32>
    %99 = arith.addf %89, %98 : vector<16x256xf32>
    %100 = vector.extract_strided_slice %33 {offsets = [0, 16], sizes = [1, 240], strides = [1, 1]} : vector<1x256xf32> to vector<1x240xf32>
    %101 = vector.extract_strided_slice %33 {offsets = [0, 0], sizes = [1, 16], strides = [1, 1]} : vector<1x256xf32> to vector<1x16xf32>
    %102 = tpu.concatenate %100, %101 in 1 : vector<1x240xf32>, vector<1x16xf32> -> vector<1x256xf32>
    %cst_26 = arith.constant 0.000000e+00 : f32
    %103 = vector.broadcast %cst_26 : f32 to vector<1x256xf32>
    %104 = arith.select %26, %102, %103 : vector<1x256xi1>, vector<1x256xf32>
    %105 = vector.extract_strided_slice %0 {offsets = [0, 7], sizes = [16, 1], strides = [1, 1]} : vector<16x9xf32> to vector<16x1xf32>
    %106 = vector.broadcast %105 : vector<16x1xf32> to vector<16x256xf32>
    %107 = vector.broadcast %104 : vector<1x256xf32> to vector<16x256xf32>
    %108 = arith.mulf %106, %107 : vector<16x256xf32>
    %109 = arith.addf %99, %108 : vector<16x256xf32>
    %110 = vector.extract_strided_slice %33 {offsets = [0, 17], sizes = [1, 239], strides = [1, 1]} : vector<1x256xf32> to vector<1x239xf32>
    %111 = vector.extract_strided_slice %33 {offsets = [0, 0], sizes = [1, 17], strides = [1, 1]} : vector<1x256xf32> to vector<1x17xf32>
    %112 = tpu.concatenate %110, %111 in 1 : vector<1x239xf32>, vector<1x17xf32> -> vector<1x256xf32>
    %cst_27 = arith.constant 0.000000e+00 : f32
    %113 = vector.broadcast %cst_27 : f32 to vector<1x256xf32>
    %114 = arith.select %31, %112, %113 : vector<1x256xi1>, vector<1x256xf32>
    %115 = vector.extract_strided_slice %0 {offsets = [0, 8], sizes = [16, 1], strides = [1, 1]} : vector<16x9xf32> to vector<16x1xf32>
    %116 = vector.broadcast %115 : vector<16x1xf32> to vector<16x256xf32>
    %117 = vector.broadcast %114 : vector<1x256xf32> to vector<16x256xf32>
    %118 = arith.mulf %116, %117 : vector<16x256xf32>
    %119 = arith.addf %109, %118 : vector<16x256xf32>
    %120 = vector.broadcast %1 : vector<16x1xf32> to vector<16x256xf32>
    %121 = arith.addf %119, %120 : vector<16x256xf32>
    %cst_28 = arith.constant 0.000000e+00 : f32
    %122 = vector.broadcast %cst_28 : f32 to vector<16x256xf32>
    %123 = arith.maximumf %121, %122 : vector<16x256xf32>
    %c0_29 = arith.constant 0 : index
    %c0_30 = arith.constant 0 : index
    %c0_31 = arith.constant 0 : index
    %124 = vector.load %arg6[%c0_29, %c0_30, %c0_31] : memref<2x16x256xf32, #tpu.memory_space<vmem>>, vector<1x16x256xf32>
    %125 = vector.shape_cast %124 : vector<1x16x256xf32> to vector<16x256xf32>
    %126 = vector.shape_cast %123 : vector<16x256xf32> to vector<1x16x256xf32>
    tpu.vector_store %arg6[%c0_29, %c0_30, %c0_31], %126 {strides = array<i32>} : memref<2x16x256xf32, #tpu.memory_space<vmem>>, vector<1x16x256xf32>,
    %c1 = arith.constant 1 : index
    %c0_32 = arith.constant 0 : index
    %c0_33 = arith.constant 0 : index
    %127 = vector.load %arg5[%c1, %c0_32, %c0_33] : memref<2x1x256xf32, #tpu.memory_space<vmem>>, vector<1x1x256xf32>
    %128 = vector.shape_cast %127 : vector<1x1x256xf32> to vector<1x256xf32>
    %cst_34 = arith.constant 0.000000e+00 : f32
    %129 = vector.broadcast %cst_34 : f32 to vector<16x256xf32>
    %130 = vector.extract_strided_slice %128 {offsets = [0, 239], sizes = [1, 17], strides = [1, 1]} : vector<1x256xf32> to vector<1x17xf32>
    %131 = vector.extract_strided_slice %128 {offsets = [0, 0], sizes = [1, 239], strides = [1, 1]} : vector<1x256xf32> to vector<1x239xf32>
    %132 = tpu.concatenate %130, %131 in 1 : vector<1x17xf32>, vector<1x239xf32> -> vector<1x256xf32>
    %cst_35 = arith.constant 0.000000e+00 : f32
    %133 = vector.broadcast %cst_35 : f32 to vector<1x256xf32>
    %134 = arith.select %8, %132, %133 : vector<1x256xi1>, vector<1x256xf32>
    %135 = vector.extract_strided_slice %0 {offsets = [0, 0], sizes = [16, 1], strides = [1, 1]} : vector<16x9xf32> to vector<16x1xf32>
    %136 = vector.broadcast %135 : vector<16x1xf32> to vector<16x256xf32>
    %137 = vector.broadcast %134 : vector<1x256xf32> to vector<16x256xf32>
    %138 = arith.mulf %136, %137 : vector<16x256xf32>
    %139 = arith.addf %129, %138 : vector<16x256xf32>
    %140 = vector.extract_strided_slice %128 {offsets = [0, 240], sizes = [1, 16], strides = [1, 1]} : vector<1x256xf32> to vector<1x16xf32>
    %141 = vector.extract_strided_slice %128 {offsets = [0, 0], sizes = [1, 240], strides = [1, 1]} : vector<1x256xf32> to vector<1x240xf32>
    %142 = tpu.concatenate %140, %141 in 1 : vector<1x16xf32>, vector<1x240xf32> -> vector<1x256xf32>
    %cst_36 = arith.constant 0.000000e+00 : f32
    %143 = vector.broadcast %cst_36 : f32 to vector<1x256xf32>
    %144 = arith.select %10, %142, %143 : vector<1x256xi1>, vector<1x256xf32>
    %145 = vector.extract_strided_slice %0 {offsets = [0, 1], sizes = [16, 1], strides = [1, 1]} : vector<16x9xf32> to vector<16x1xf32>
    %146 = vector.broadcast %145 : vector<16x1xf32> to vector<16x256xf32>
    %147 = vector.broadcast %144 : vector<1x256xf32> to vector<16x256xf32>
    %148 = arith.mulf %146, %147 : vector<16x256xf32>
    %149 = arith.addf %139, %148 : vector<16x256xf32>
    %150 = vector.extract_strided_slice %128 {offsets = [0, 241], sizes = [1, 15], strides = [1, 1]} : vector<1x256xf32> to vector<1x15xf32>
    %151 = vector.extract_strided_slice %128 {offsets = [0, 0], sizes = [1, 241], strides = [1, 1]} : vector<1x256xf32> to vector<1x241xf32>
    %152 = tpu.concatenate %150, %151 in 1 : vector<1x15xf32>, vector<1x241xf32> -> vector<1x256xf32>
    %cst_37 = arith.constant 0.000000e+00 : f32
    %153 = vector.broadcast %cst_37 : f32 to vector<1x256xf32>
    %154 = arith.select %15, %152, %153 : vector<1x256xi1>, vector<1x256xf32>
    %155 = vector.extract_strided_slice %0 {offsets = [0, 2], sizes = [16, 1], strides = [1, 1]} : vector<16x9xf32> to vector<16x1xf32>
    %156 = vector.broadcast %155 : vector<16x1xf32> to vector<16x256xf32>
    %157 = vector.broadcast %154 : vector<1x256xf32> to vector<16x256xf32>
    %158 = arith.mulf %156, %157 : vector<16x256xf32>
    %159 = arith.addf %149, %158 : vector<16x256xf32>
    %160 = vector.extract_strided_slice %128 {offsets = [0, 255], sizes = [1, 1], strides = [1, 1]} : vector<1x256xf32> to vector<1x1xf32>
    %161 = vector.extract_strided_slice %128 {offsets = [0, 0], sizes = [1, 255], strides = [1, 1]} : vector<1x256xf32> to vector<1x255xf32>
    %162 = tpu.concatenate %160, %161 in 1 : vector<1x1xf32>, vector<1x255xf32> -> vector<1x256xf32>
    %cst_38 = arith.constant 0.000000e+00 : f32
    %163 = vector.broadcast %cst_38 : f32 to vector<1x256xf32>
    %164 = arith.select %17, %162, %163 : vector<1x256xi1>, vector<1x256xf32>
    %165 = vector.extract_strided_slice %0 {offsets = [0, 3], sizes = [16, 1], strides = [1, 1]} : vector<16x9xf32> to vector<16x1xf32>
    %166 = vector.broadcast %165 : vector<16x1xf32> to vector<16x256xf32>
    %167 = vector.broadcast %164 : vector<1x256xf32> to vector<16x256xf32>
    %168 = arith.mulf %166, %167 : vector<16x256xf32>
    %169 = arith.addf %159, %168 : vector<16x256xf32>
    %170 = vector.extract_strided_slice %0 {offsets = [0, 4], sizes = [16, 1], strides = [1, 1]} : vector<16x9xf32> to vector<16x1xf32>
    %171 = vector.broadcast %170 : vector<16x1xf32> to vector<16x256xf32>
    %172 = vector.broadcast %128 : vector<1x256xf32> to vector<16x256xf32>
    %173 = arith.mulf %171, %172 : vector<16x256xf32>
    %174 = arith.addf %169, %173 : vector<16x256xf32>
    %175 = vector.extract_strided_slice %128 {offsets = [0, 1], sizes = [1, 255], strides = [1, 1]} : vector<1x256xf32> to vector<1x255xf32>
    %176 = vector.extract_strided_slice %128 {offsets = [0, 0], sizes = [1, 1], strides = [1, 1]} : vector<1x256xf32> to vector<1x1xf32>
    %177 = tpu.concatenate %175, %176 in 1 : vector<1x255xf32>, vector<1x1xf32> -> vector<1x256xf32>
    %cst_39 = arith.constant 0.000000e+00 : f32
    %178 = vector.broadcast %cst_39 : f32 to vector<1x256xf32>
    %179 = arith.select %19, %177, %178 : vector<1x256xi1>, vector<1x256xf32>
    %180 = vector.extract_strided_slice %0 {offsets = [0, 5], sizes = [16, 1], strides = [1, 1]} : vector<16x9xf32> to vector<16x1xf32>
    %181 = vector.broadcast %180 : vector<16x1xf32> to vector<16x256xf32>
    %182 = vector.broadcast %179 : vector<1x256xf32> to vector<16x256xf32>
    %183 = arith.mulf %181, %182 : vector<16x256xf32>
    %184 = arith.addf %174, %183 : vector<16x256xf32>
    %185 = vector.extract_strided_slice %128 {offsets = [0, 15], sizes = [1, 241], strides = [1, 1]} : vector<1x256xf32> to vector<1x241xf32>
    %186 = vector.extract_strided_slice %128 {offsets = [0, 0], sizes = [1, 15], strides = [1, 1]} : vector<1x256xf32> to vector<1x15xf32>
    %187 = tpu.concatenate %185, %186 in 1 : vector<1x241xf32>, vector<1x15xf32> -> vector<1x256xf32>
    %cst_40 = arith.constant 0.000000e+00 : f32
    %188 = vector.broadcast %cst_40 : f32 to vector<1x256xf32>
    %189 = arith.select %24, %187, %188 : vector<1x256xi1>, vector<1x256xf32>
    %190 = vector.extract_strided_slice %0 {offsets = [0, 6], sizes = [16, 1], strides = [1, 1]} : vector<16x9xf32> to vector<16x1xf32>
    %191 = vector.broadcast %190 : vector<16x1xf32> to vector<16x256xf32>
    %192 = vector.broadcast %189 : vector<1x256xf32> to vector<16x256xf32>
    %193 = arith.mulf %191, %192 : vector<16x256xf32>
    %194 = arith.addf %184, %193 : vector<16x256xf32>
    %195 = vector.extract_strided_slice %128 {offsets = [0, 16], sizes = [1, 240], strides = [1, 1]} : vector<1x256xf32> to vector<1x240xf32>
    %196 = vector.extract_strided_slice %128 {offsets = [0, 0], sizes = [1, 16], strides = [1, 1]} : vector<1x256xf32> to vector<1x16xf32>
    %197 = tpu.concatenate %195, %196 in 1 : vector<1x240xf32>, vector<1x16xf32> -> vector<1x256xf32>
    %cst_41 = arith.constant 0.000000e+00 : f32
    %198 = vector.broadcast %cst_41 : f32 to vector<1x256xf32>
    %199 = arith.select %26, %197, %198 : vector<1x256xi1>, vector<1x256xf32>
    %200 = vector.extract_strided_slice %0 {offsets = [0, 7], sizes = [16, 1], strides = [1, 1]} : vector<16x9xf32> to vector<16x1xf32>
    %201 = vector.broadcast %200 : vector<16x1xf32> to vector<16x256xf32>
    %202 = vector.broadcast %199 : vector<1x256xf32> to vector<16x256xf32>
    %203 = arith.mulf %201, %202 : vector<16x256xf32>
    %204 = arith.addf %194, %203 : vector<16x256xf32>
    %205 = vector.extract_strided_slice %128 {offsets = [0, 17], sizes = [1, 239], strides = [1, 1]} : vector<1x256xf32> to vector<1x239xf32>
    %206 = vector.extract_strided_slice %128 {offsets = [0, 0], sizes = [1, 17], strides = [1, 1]} : vector<1x256xf32> to vector<1x17xf32>
    %207 = tpu.concatenate %205, %206 in 1 : vector<1x239xf32>, vector<1x17xf32> -> vector<1x256xf32>
    %cst_42 = arith.constant 0.000000e+00 : f32
    %208 = vector.broadcast %cst_42 : f32 to vector<1x256xf32>
    %209 = arith.select %31, %207, %208 : vector<1x256xi1>, vector<1x256xf32>
    %210 = vector.extract_strided_slice %0 {offsets = [0, 8], sizes = [16, 1], strides = [1, 1]} : vector<16x9xf32> to vector<16x1xf32>
    %211 = vector.broadcast %210 : vector<16x1xf32> to vector<16x256xf32>
    %212 = vector.broadcast %209 : vector<1x256xf32> to vector<16x256xf32>
    %213 = arith.mulf %211, %212 : vector<16x256xf32>
    %214 = arith.addf %204, %213 : vector<16x256xf32>
    %215 = vector.broadcast %1 : vector<16x1xf32> to vector<16x256xf32>
    %216 = arith.addf %214, %215 : vector<16x256xf32>
    %cst_43 = arith.constant 0.000000e+00 : f32
    %217 = vector.broadcast %cst_43 : f32 to vector<16x256xf32>
    %218 = arith.maximumf %216, %217 : vector<16x256xf32>
    %c1_44 = arith.constant 1 : index
    %c0_45 = arith.constant 0 : index
    %c0_46 = arith.constant 0 : index
    %219 = vector.load %arg6[%c1_44, %c0_45, %c0_46] : memref<2x16x256xf32, #tpu.memory_space<vmem>>, vector<1x16x256xf32>
    %220 = vector.shape_cast %219 : vector<1x16x256xf32> to vector<16x256xf32>
    %221 = vector.shape_cast %218 : vector<16x256xf32> to vector<1x16x256xf32>
    tpu.vector_store %arg6[%c1_44, %c0_45, %c0_46], %221 {strides = array<i32>} : memref<2x16x256xf32, #tpu.memory_space<vmem>>, vector<1x16x256xf32>,
    return
  }
  func.func @transform_0(%arg0: i32) -> (i32, i32) {
    %c0_i32 = arith.constant 0 : i32
    %c0_i32_0 = arith.constant 0 : i32
    %c0_i32_1 = arith.constant 0 : i32
    return %c0_i32, %c0_i32_0 : i32, i32
  }
  func.func @transform_1(%arg0: i32) -> (i32, i32) {
    %c0_i32 = arith.constant 0 : i32
    %c0_i32_0 = arith.constant 0 : i32
    %c0_i32_1 = arith.constant 0 : i32
    return %c0_i32, %c0_i32_0 : i32, i32
  }
  func.func @transform_2(%arg0: i32) -> (i32, i32) {
    %c0_i32 = arith.constant 0 : i32
    %c0_i32_0 = arith.constant 0 : i32
    %c0_i32_1 = arith.constant 0 : i32
    return %c0_i32, %c0_i32_0 : i32, i32
  }
  func.func @transform_3(%arg0: i32) -> (i32, i32) {
    %c0_i32 = arith.constant 0 : i32
    %c0_i32_0 = arith.constant 0 : i32
    %c0_i32_1 = arith.constant 0 : i32
    return %c0_i32, %c0_i32_0 : i32, i32
  }
  func.func @transform_4(%arg0: i32) -> (i32, i32, i32) {
    %c0_i32 = arith.constant 0 : i32
    %c0_i32_0 = arith.constant 0 : i32
    %c0_i32_1 = arith.constant 0 : i32
    return %arg0, %c0_i32, %c0_i32_0 : i32, i32, i32
  }
  func.func @transform_5(%arg0: i32) -> (i32, i32, i32) {
    %c0_i32 = arith.constant 0 : i32
    %c0_i32_0 = arith.constant 0 : i32
    %c0_i32_1 = arith.constant 0 : i32
    return %arg0, %c0_i32, %c0_i32_0 : i32, i32, i32
  }
}

</mosaic_0001>

<bundles_post_ra>
// kernel: tpu_custom_call.1
= control target key start
LH: loop header
LB: loop body
LE: loop exit
PB: predicated region body
PF: predicated region fallthrough
CT: control target
= control target key end

     0   :  { %10 = vsyncpa [#allocation3], 0  ;;  %s2005_s0 = inlined_call_operand.vmem [shape: f32[16,9], index: 0, kind: input, shape index: {}]   ;;  %s2006_s1 = inlined_call_operand.vmem [shape: f32[16,1], index: 1, kind: input, shape index: {}]   ;;  %s2007_s2 = inlined_call_operand.hbm [shape: s32[1,256], index: 2, kind: input, shape index: {}]   ;;  %s2008_s3 = inlined_call_operand.vmem [shape: s32[1,256], index: 3, kind: input, shape index: {}]   ;;  %s2009_s4 = inlined_call_operand.vmem [shape: f32[4,1,256], index: 4, kind: input, shape index: {}]   ;;  %s2010_s5 = inlined_call_operand.hbm [shape: f32[4,16,256], index: 5, kind: output, shape index: {}]  }
   0x1   :  { %11 = vsyncpa [#allocation4], 0 }
   0x2   :  { %13 = vsyncpa [#allocation4 + $0x1], 0  ;;  %s1477_s18 = smov 0   ;;  %s1479_s19 = smov 0  }
   0x3   :  { %s1481_s20 = smov 0   ;;  %s1483_s21 = smov 0  }
   0x4 LB: > { %s1498_s22 = sadd.s32 4294967295, %s1424_s21   ;;  %s1220_s23 = sadd.s32 4294967294, %s1424_s21   ;;  %s1424_s21 = sphi %s1483_s21, %s2034_s21   ;;  %s1420_s20 = sphi %s1481_s20, %s2033_s20   ;;  %s1416_s19 = sphi %s1479_s19, %s2032_s19   ;;  %s1412_s18 = sphi %s1477_s18, %s2031_s18  }
   0x5   : > { %s1502_s24 = sadd.s32 1, %s1424_s21   ;;  %s136_s25 = sadd.s32 1, %s1420_s20 }
   0x6   : > { %s133_s26 = ssub.s32 %s1424_s21, %s1502_s24  ;;  %p146_p0 = scmp.ne.s32.totalorder %s1420_s20, %s1416_s19 }
   0x7   : > { %p134_p1 = scmp.eq.s32.totalorder %s133_s26, 0  ;;  %p147_p2 = scmp.eq.s32.totalorder %s1498_s22, 1 }
   0x8   : > { %p152_p3 = scmp.ne.s32.totalorder %s1416_s19, %s1412_s18  ;;  %p153_p4 = scmp.eq.s32.totalorder %s1220_s23, 1 }
   0x9   : > { %s1513_s27 = scalar_select %p134_p1, %s1420_s20, %s136_s25  }
   0xa   : > { %p1515_p5 = por %p147_p2, %p146_p0  ;;  %p1519_p6 = por %p153_p4, %p152_p3 }
   0xb   : > { %p1221_p7 = scmp.ge.s32.totalorder %s1424_s21, 1  ;;  %p160_p8 = scmp.lt.s32.totalorder %s1424_s21, 3 }
   0xc   : > { %s2014_s28 = scalar_select %p1515_p5, 1, 0 }
   0xd   : > { %s2015_s29 = scalar_select %p1519_p6, 1, 0 }
   0xe   : > { %p2011_p9 = scmp.eq.s32.totalorder %s1498_s22, 0  ;;  %p1526_p10 = pnand %p1221_p7, %p160_p8 }
   0xf   : > { %s1426_s6 = smov [#allocation2]   ;;  %s1330_s11 = scalar_lea.hbm %s2007_s2, 32 }
  0x10   : > { %s2016_s30 = scalar_select %p1526_p10, 1, 0 }
  0x11   : > { %s179_s7 = sshll.u32 %s1426_s6, 4  ;;  %p1248_p11 = pneg %p1526_p10  ;;  %s180_s7 = int_to_ptr.vmem [resolvable:$true] %s179_s7 }
  0x12   : > { %p1331_p13 = scmp.ne.s32.totalorder %s2007_s2, %s1330_s11  ;;  %p1337_p3 = scmp.lt.u32.totalorder %s1330_s11, %s2007_s2 }
  0x13   : > { %p1534_p12 = pnand %p2011_p9, %p1248_p11 }
  0x15   : > { %p1332_p0 = pneg %p1534_p12 }
  0x17   : > { %p1333_p1 = pnand %p1332_p0, %p1331_p13 }
  0x19   : > { %p1334_p2 = pneg %p1333_p1 }
  0x1b   : > { %p1339_p4 = pnand %p1337_p3, %p1334_p2 }
  0x1d   : > { %1342 = shalt.err (!%p1339_p4)
}
  0x1e   : > { %s1343_s16 = scalar_lea.vmem %s180_s7, 32  ;;  %p1351_p9 = scmp.lt.s32.totalorder %s180_s7, %s180_s7 }
  0x1f   : > { %p1344_p7 = scmp.ne.s32.totalorder %s180_s7, %s1343_s16  ;;  %p1352_p6 = scmp.lt.s32.totalorder %s1343_s16, %s1343_s16 }
  0x21   : > { %p1346_p8 = pnand %p1344_p7, %p1332_p0  ;;  %p1353_p5 = por %p1352_p6, %p1351_p9 }
  0x23   : > { %p1347_p11 = pneg %p1346_p8 }
  0x25   : > { %p1354_p10 = pnand %p1353_p5, %p1347_p11 }
  0x27   : > { %1357 = shalt.err (!%p1354_p10)
}
  0x28   : > { %1251 = dma.hbm_to_vmem [thread:$0]  (!%p1534_p12), %s2007_s2, 32, %s180_s7, [#allocation3]  }
  0x29   : > { %p2018_p13 = scmp.ne.s32.totalorder %s2016_s30, 0 }
  0x2a   : > { %p2019_p1 = scmp.eq.s32.totalorder (!%p2018_p13), %s1498_s22, 0 }
  0x2b   : > { %204 = sbr.rel (%p2018_p13) target bundleno = 320 (0x140), region = 40 }
  0x32   : > { %1403 = dma.done.wait (%p2019_p1), [#allocation3], 32   ;;  %p2020_p0 = pmov %p2019_p1 }
  0x33   : > { %s1227_s25 = sshll.u32 %s1498_s22, 1  ;;  %v255_v0 = vlaneseq  ;;  %v1427_v1 = vmov 0   ;;  %v1428_v2 = vmov 1   ;;  %v1578_v6 = vld [vmem:[%s2005_s0] sm:$0xff]  ;;  %v1588_v9 = vld [vmem:[%s2005_s0 + $0x8] sm:$0xff]  ;;  %s1429_s12 = smov 17  }
  0x34   : > { %1405 = vsyncadd (%p2020_p0), [#allocation3], 4294967264  ;;  %1311 = vset.pattern.permute.xlu1 %v1427_v1  ;;  %p233_p5 = scmp.lt.s32.totalorder %s1227_s25, 3  ;;  %1312 = vset.pattern.permute.xlu0 %v1428_v2  ;;  %s1430_s13 = smov 16   ;;  %v1432_v11 = vmov 2   ;;  %v1434_v12 = vmov 3  }
  0x35   : > { %v1562_v3 = vshrl.u32 %v255_v0, 7  ;;  %292 = vperm.xlu1 %1311, %v1578_v6   ;;  %s1431_s14 = smov 15   ;;  %s1433_s15 = smov 1   ;;  %v1435_v14 = vmov 4   ;;  %v1436_v16 = vmov 5   ;;  %v1440_v18 = vmov 6  }
  0x36   : > { %s2036_s25 = smov (!%p233_p5, %s1227_s25), 3  ;;  %s1437_s16 = smov 127   ;;  %v1442_v19 = vmov 7   ;;  %v1443_v20 = vmov 8   ;;  %v1444_v21 = vmov 1966171168  }
  0x37   : > { %v1565_v4 = vsub.s32 1, %v1562_v3  ;;  %s1228_s26 = sshll.u32 %s2036_s25, 1  ;;  %v1573_v5 = vsub.s32 0, %v1562_v3  ;;  %s1438_s17 = smov 113   ;;  %v275_v22 = vunpack.c.l.s4 %v1444_v21  ;;  %v241_v23 = vld [vmem:[%s2006_s1] sm:$0xff]  ;;  %v242_v26 = vld [vmem:[%s2006_s1 + $0x8] sm:$0xff] }
  0x38   : > { %s1570_s7 = scalar_lea.vmem %s2009_s4, %s1228_s26  ;;  %s1439_s23 = smov 112   ;;  %vm268_vm0 = vcmask 138240   ;;  %v1673_v27 = vld [vmem:[#allocation2] sm:$0x3]  ;;  %vm324_vm4 = vcmask 130048   ;;  %vm378_vm5 = vcmask 121856  }
  0x39   : > { %v253_v7 = vld [vmem:[%s1570_s7] sm:$0x3]  ;;  %297 = vperm.xlu1 %1311, %v1588_v9   ;;  %v1229_v13 = vld [vmem:[%s1570_s7 + $0x2] sm:$0x3]  ;;  %s1441_s25 = smov 111   ;;  %v276_v24 = vunpack.c.0.s8 %v275_v22  ;;  %vm245_vm1 = vcmp.ge.s32.totalorder %v1673_v27, 1 }
  0x3a   : > { %v1583_v8 = vrot.slane %v253_v7, %v1565_v4  ;;  %v1593_v10 = vrot.slane %v253_v7, %v1573_v5  ;;  %v1619_v15 = vrot.slane %v1229_v13, %v1565_v4  ;;  %v1629_v17 = vrot.slane %v1229_v13, %v1573_v5  ;;  %v1678_v28 = vld [vmem:[%s2008_s3] sm:$0x3]  ;;  %s229_s10 = sand.u32 1, %s1416_s19   ;;  %p2029_p9 = scmp.ne.s32.totalorder %s2014_s28, 0 }
  0x3b   : > { %v1681_v29 = vsub.s32 %v276_v24, %v1562_v3  ;;  %vm246_vm2 = vcmp.ge.s32.totalorder %v1678_v28, 1  ;;  %vm248_vm6 = vcmp.le.s32.totalorder %v1678_v28, 14  ;;  %vm432_vm8 = vcmask 7168   ;;  %s1226_s11 = sshll.u32 %s229_s10, 6  ;;  %s1445_s26 = smov [#allocation5]  }
  0x3c   : > { %259 = vrot.lane.b32.xlu0 %v1583_v8, %s1429_s12  ;;  %vm1692_vm3 = vmand %vm245_vm1, %vm246_vm2  ;;  %vm503_vm9 = vcmask 1039360   ;;  %vm557_vm10 = vcmask 924672   ;;  %vm250_vm11 = vcmp.le.s32.totalorder %v1673_v27, 14  ;;  %vm611_vm12 = vcmask 916480   ;;  %s1362_s30 = sshll.u32 %s1445_s26, 4  ;;  %s1363_s30 = int_to_ptr.vmem [resolvable:$false] %s1362_s30 }
  0x3d   : > { %322 = vrot.lane.b32.xlu1 %v1593_v10, %s1430_s13  ;;  %vm1737_vm7 = vmand %vm245_vm1, %vm248_vm6  ;;  %vm665_vm14 = vcmask 908288   ;;  %s1364_s6 = scalar_lea.vmem %s1363_s30, 2048 }
  0x3e   : > { %1313 = vset.pattern.permute.xlu1 %v1428_v2  ;;  %vm1889_vm13 = vmand %vm250_vm11, %vm246_vm2 }
  0x3f   : > { %vm1933_vm15 = vmand %vm250_vm11, %vm248_vm6 }
  0x40   : > { %266 = vrot.lane.b32.xlu0 %v1593_v10, %s1429_s12 }
  0x41   : > { %351 = vperm.xlu1 %1313, %v1588_v9  }
  0x44   : > { %319 = vrot.lane.b32.xlu0 %v1583_v8, %s1430_s13 }
  0x45   : > { %373 = vrot.lane.b32.xlu1 %v1583_v8, %s1431_s14 }
  0x46   : > { %1314 = vset.pattern.permute.xlu1 %v1432_v11 }
  0x48   : > { %347 = vperm.xlu0 %1312, %v1578_v6  }
  0x49   : > { %401 = vperm.xlu1 %1314, %v1578_v6  }
  0x4c   : > { %376 = vrot.lane.b32.xlu0 %v1593_v10, %s1431_s14 }
  0x4d   : > { %1315 = vset.pattern.permute.xlu0 %v1432_v11  ;;  %427 = vrot.lane.b32.xlu1 %v1583_v8, %s1433_s15 }
  0x4e   : > { %1317 = vset.pattern.permute.xlu1 %v1434_v12 }
  0x50   : > { %405 = vperm.xlu0 %1315, %v1588_v9  }
  0x51   : > { %430 = vrot.lane.b32.xlu1 %v1593_v10, %s1433_s15 }
  0x54   : > { %1316 = vset.pattern.permute.xlu0 %v1434_v12 }
  0x55   : > { %455 = vperm.xlu0 %1316, %v1578_v6   ;;  %459 = vperm.xlu1 %1317, %v1588_v9  }
  0x59   : > { %1319 = vset.pattern.permute.xlu0 %v1435_v14  ;;  %1318 = vset.pattern.permute.xlu1 %v1435_v14 }
  0x5a   : > { %486 = vperm.xlu0 %1319, %v1588_v9   ;;  %482 = vperm.xlu1 %1318, %v1578_v6  }
  0x5e   : > { %793 = vrot.lane.b32.xlu0 %v1619_v15, %s1430_s13  ;;  %744 = vrot.lane.b32.xlu1 %v1619_v15, %s1429_s12 }
  0x5f   : > { %1320 = vset.pattern.permute.xlu0 %v1436_v16  ;;  %1321 = vset.pattern.permute.xlu1 %v1436_v16 }
  0x62   : > { %838 = vrot.lane.b32.xlu0 %v1619_v15, %s1431_s14  ;;  %751 = vrot.lane.b32.xlu1 %v1629_v17, %s1429_s12  ;;  %s1241_s12 = sshll.u32 %s1498_s22, 10  ;;  %s1963_s22 = scalar_lea.sflag [#allocation4], %s229_s10 }
  0x66   : > { %883 = vrot.lane.b32.xlu0 %v1619_v15, %s1433_s15  ;;  %796 = vrot.lane.b32.xlu1 %v1629_v17, %s1430_s13 }
  0x6a   : > { %499 = vrot.lane.b32.xlu0 %v1593_v10, %s1437_s16  ;;  %841 = vrot.lane.b32.xlu1 %v1629_v17, %s1431_s14  ;;  %s231_s14 = scalar_lea.vmem [#allocation5], %s1226_s11 }
  0x6e   : > { %938 = vrot.lane.b32.xlu0 %v1629_v17, %s1437_s16  ;;  %886 = vrot.lane.b32.xlu1 %v1629_v17, %s1433_s15  ;;  %s1146_s15 = sshll.u32 %s231_s14, 4  ;;  %s1959_s15 = int_to_ptr.vmem [resolvable:$true] %s1146_s15 }
  0x6f   : > { %p1365_p2 = scmp.lt.s32.totalorder %s1959_s15, %s1363_s30 }
  0x72   : > { %553 = vrot.lane.b32.xlu0 %v1593_v10, %s1438_s17  ;;  %501 = vrot.lane.b32.xlu1 %v1583_v8, %s1437_s16 }
  0x76   : > { %983 = vrot.lane.b32.xlu0 %v1629_v17, %s1438_s17  ;;  %940 = vrot.lane.b32.xlu1 %v1619_v15, %s1437_s16 }
  0x7a   : > { %527 = vperm.xlu0 %1320, %v1578_v6   ;;  %555 = vrot.lane.b32.xlu1 %v1583_v8, %s1438_s17 }
  0x7e   : > { %609 = vrot.lane.b32.xlu0 %v1583_v8, %s1439_s23  ;;  %985 = vrot.lane.b32.xlu1 %v1619_v15, %s1438_s17 }
  0x7f   : > { %1323 = vset.pattern.permute.xlu0 %v1440_v18 }
  0x82   : > { %1030 = vrot.lane.b32.xlu0 %v1619_v15, %s1439_s23  ;;  %531 = vperm.xlu1 %1321, %v1588_v9  }
  0x86   : > { %585 = vperm.xlu0 %1323, %v1588_v9   ;;  %607 = vrot.lane.b32.xlu1 %v1593_v10, %s1439_s23 }
  0x87   : > { %1322 = vset.pattern.permute.xlu1 %v1440_v18 }
  0x8a   : > { %1073 = vrot.lane.b32.xlu0 %v1629_v17, %s1441_s25  ;;  %1028 = vrot.lane.b32.xlu1 %v1629_v17, %s1439_s23  ;;  %s1957_s23 = scalar_lea.hbm %s2010_s5, %s1241_s12 }
  0x8b   : > { %1324 = vset.pattern.permute.xlu0 %v1442_v19 }
  0x8e   : > { %635 = vperm.xlu0 %1324, %v1578_v6   ;;  %581 = vperm.xlu1 %1322, %v1578_v6  }
  0x92   : > { %1327 = vset.pattern.permute.xlu0 %v1443_v20  ;;  %661 = vrot.lane.b32.xlu1 %v1593_v10, %s1441_s25 }
  0x93   : > { %693 = vperm.xlu0 %1327, %v1588_v9   ;;  %1325 = vset.pattern.permute.xlu1 %v1442_v19 }
  0x96   : > { %663 = vrot.lane.b32.xlu1 %v1583_v8, %s1441_s25 }
  0x97   : > { %1329 = vset.pattern.permute.xlu0 %v1427_v1 }
  0x9a   : > { %1075 = vrot.lane.b32.xlu1 %v1619_v15, %s1441_s25  ;;  %s1358_s25 = scalar_lea.vmem %s1959_s15, 1024 }
  0x9b   : > { %p1359_p6 = scmp.ne.s32.totalorder %s1959_s15, %s1358_s25  ;;  %p1366_p3 = scmp.lt.s32.totalorder %s1364_s6, %s1358_s25 }
  0x9d   : > { %p1360_p10 = pnand %p1359_p6, %p2029_p9  ;;  %p1367_p4 = por %p1366_p3, %p1365_p2 }
  0x9e   : > { %639 = vperm.xlu1 %1325, %v1588_v9  }
  0x9f   : > { %p1361_p12 = pneg %p1360_p10 }
  0xa1   : > { %p1368_p7 = pnand %p1367_p4, %p1361_p12 }
  0xa2   : > { %1326 = vset.pattern.permute.xlu1 %v1443_v20 }
  0xa3   : > { %689 = vperm.xlu1 %1326, %v1578_v6  }
  0xa7   : > { %1328 = vset.pattern.permute.xlu1 %v1427_v1 }
  0xa8   : > { %717 = vperm.xlu1 %1328, %v241_v23  }
  0xac   : > { %722 = vperm.xlu1 %1328, %v242_v26  }
  0xae   : > { %v260_v25 = vpop.permute.xlu0 %259 }
  0xb2   : > { %v267_v30 = vpop.permute.xlu0 %266 }
  0xb3   : > { %v269_v31 = vsel %vm268_vm0, %v267_v30, %v260_v25  ;;  %v271_v32 = vsel %vm268_vm0, %v260_v25, %v267_v30 }
  0xb4   : > { %v273_v33 = vcombine.low %v271_v32, %v269_v31  ;;  %v1697_v37 = vpop.permute.xlu1 %292 }
  0xb6   : > { %v280_v34 = vrot.slane %v273_v33, %v1681_v29  ;;  %v320_v46 = vpop.permute.xlu0 %319 }
  0xb8   : > { %v287_v36 = vrot.slane %v280_v34, %v1681_v29  ;;  %v1705_v43 = vpop.permute.xlu1 %297 }
  0xba   : > { %v289_v38 = vsel %vm1692_vm3, %v287_v36, 0.0 }
  0xbb   : > { %v304_v39 = vrot.slane %v289_v38, %v1573_v5  ;;  %v308_v40 = vrot.slane %v289_v38, %v1565_v4 }
  0xbc   : > { %v323_v47 = vpop.permute.xlu1 %322 }
  0xbd   : > { %v311_v41 = vmul.f32 %v304_v39, %v1697_v37  ;;  %v312_v42 = vmul.f32 %v308_v40, %v1697_v37  ;;  %v313_v44 = vmul.f32 %v304_v39, %v1705_v43  ;;  %v314_v45 = vmul.f32 %v308_v40, %v1705_v43 }
  0xbe   : > { %v325_v48 = vsel %vm324_vm4, %v323_v47, %v320_v46  ;;  %v327_v49 = vsel %vm324_vm4, %v320_v46, %v323_v47 }
  0xbf   : > { %v329_v50 = vcombine.low %v327_v49, %v325_v48 }
  0xc0   : > { %v1712_v52 = vpop.permute.xlu1 %351 }
  0xc1   : > { %v336_v51 = vrot.slane %v329_v50, %v1681_v29 }
  0xc3   : > { %v343_v53 = vrot.slane %v336_v51, %v1681_v29 }
  0xc4   : > { %v374_v56 = vpop.permute.xlu1 %373 }
  0xc5   : > { %v345_v55 = vsel %vm245_vm1, %v343_v53, 0.0 }
  0xc6   : > { %v358_v57 = vrot.slane %v345_v55, %v1573_v5  ;;  %v362_v58 = vrot.slane %v345_v55, %v1565_v4 }
  0xc7   : > { %v1715_v54 = vpop.permute.xlu0 %347 }
  0xc8   : > { %v367_v60 = vmul.f32 %v358_v57, %v1712_v52  ;;  %v368_v61 = vmul.f32 %v362_v58, %v1712_v52  ;;  %v365_v62 = vmul.f32 %v358_v57, %v1715_v54  ;;  %v366_v63 = vmul.f32 %v362_v58, %v1715_v54  ;;  %v1727_v2 = vpop.permute.xlu1 %401 }
  0xca   : > { %v371_v3 = vadd.f32 %v367_v60, %v313_v44  ;;  %v372_v6 = vadd.f32 %v368_v61, %v314_v45  ;;  %v369_v7 = vadd.f32 %v365_v62, %v311_v41  ;;  %v370_v9 = vadd.f32 %v366_v63, %v312_v42 }
  0xcb   : > { %v377_v59 = vpop.permute.xlu0 %376 }
  0xcc   : > { %v379_v0 = vsel %vm378_vm5, %v377_v59, %v374_v56  ;;  %v381_v1 = vsel %vm378_vm5, %v374_v56, %v377_v59  ;;  %v428_v14 = vpop.permute.xlu1 %427 }
  0xcd   : > { %v383_v11 = vcombine.low %v381_v1, %v379_v0 }
  0xcf   : > { %v1730_v12 = vpop.permute.xlu0 %405  ;;  %v390_v13 = vrot.slane %v383_v11, %v1681_v29 }
  0xd0   : > { %v431_v21 = vpop.permute.xlu1 %430 }
  0xd1   : > { %v397_v18 = vrot.slane %v390_v13, %v1681_v29  ;;  %v433_v24 = vsel %vm432_vm8, %v431_v21, %v428_v14  ;;  %v435_v25 = vsel %vm432_vm8, %v428_v14, %v431_v21 }
  0xd2   : > { %v437_v26 = vcombine.low %v435_v25, %v433_v24 }
  0xd3   : > { %v399_v20 = vsel %vm1737_vm7, %v397_v18, 0.0 }
  0xd4   : > { %v1742_v19 = vpop.permute.xlu0 %455  ;;  %v412_v22 = vrot.slane %v399_v20, %v1573_v5  ;;  %v416_v23 = vrot.slane %v399_v20, %v1565_v4  ;;  %v444_v34 = vrot.slane %v437_v26, %v1681_v29  ;;  %v1755_v36 = vpop.permute.xlu1 %459 }
  0xd6   : > { %v419_v30 = vmul.f32 %v412_v22, %v1727_v2  ;;  %v420_v31 = vmul.f32 %v416_v23, %v1727_v2  ;;  %v421_v32 = vmul.f32 %v412_v22, %v1730_v12  ;;  %v422_v33 = vmul.f32 %v416_v23, %v1730_v12 }
  0xd7   : > { %v451_v44 = vrot.slane %v444_v34, %v1681_v29 }
  0xd8   : > { %v423_v39 = vadd.f32 %v419_v30, %v369_v7  ;;  %v424_v40 = vadd.f32 %v420_v31, %v370_v9  ;;  %v425_v41 = vadd.f32 %v421_v32, %v371_v3  ;;  %v426_v42 = vadd.f32 %v422_v33, %v372_v6 }
  0xd9   : > { %v1757_v38 = vpop.permute.xlu0 %486  ;;  %v453_v45 = vsel %vm246_vm2, %v451_v44, 0.0  ;;  %v1764_v49 = vpop.permute.xlu1 %482 }
  0xda   : > { %v466_v47 = vrot.slane %v453_v45, %v1573_v5  ;;  %v470_v48 = vrot.slane %v453_v45, %v1565_v4  ;;  %v491_v56 = vmul.f32 %v1764_v49, %v1593_v10  ;;  %v492_v57 = vmul.f32 %v1764_v49, %v1583_v8 }
  0xdb   : > { %v930_v16 = vmul.f32 %v1629_v17, %v1764_v49 }
  0xdc   : > { %v473_v50 = vmul.f32 %v466_v47, %v1742_v19  ;;  %v474_v51 = vmul.f32 %v470_v48, %v1742_v19  ;;  %v475_v53 = vmul.f32 %v466_v47, %v1755_v36  ;;  %v476_v55 = vmul.f32 %v470_v48, %v1755_v36 }
  0xdd   : > { %v794_v46 = vpop.permute.xlu0 %793  ;;  %v745_v63 = vpop.permute.xlu1 %744 }
  0xde   : > { %v477_v59 = vadd.f32 %v473_v50, %v423_v39  ;;  %v478_v60 = vadd.f32 %v474_v51, %v424_v40  ;;  %v1774_v61 = vadd.f32 %v475_v53, %v425_v41  ;;  %v1776_v62 = vadd.f32 %v476_v55, %v426_v42 }
  0xdf   : > { %v494_v55 = vmul.f32 %v1757_v38, %v1583_v8  ;;  %v1826_v8 = vmul.f32 %v1619_v15, %v1757_v38 }
  0xe0   : > { %v1778_v0 = vadd.f32 %v491_v56, %v477_v59  ;;  %v1780_v1 = vadd.f32 %v492_v57, %v478_v60 }
  0xe1   : > { %v839_v58 = vpop.permute.xlu0 %838  ;;  %v752_v6 = vpop.permute.xlu1 %751 }
  0xe2   : > { %v753_v7 = vsel %vm268_vm0, %v752_v6, %v745_v63  ;;  %v755_v9 = vsel %vm268_vm0, %v745_v63, %v752_v6 }
  0xe3   : > { %v757_v11 = vcombine.low %v755_v9, %v753_v7 }
  0xe5   : > { %v884_v3 = vpop.permute.xlu0 %883  ;;  %v764_v14 = vrot.slane %v757_v11, %v1681_v29  ;;  %v797_v18 = vpop.permute.xlu1 %796 }
  0xe6   : > { %v798_v20 = vsel %vm324_vm4, %v797_v18, %v794_v46  ;;  %v800_v21 = vsel %vm324_vm4, %v794_v46, %v797_v18 }
  0xe7   : > { %v771_v22 = vrot.slane %v764_v14, %v1681_v29  ;;  %v802_v23 = vcombine.low %v800_v21, %v798_v20 }
  0xe9   : > { %v500_v13 = vpop.permute.xlu0 %499  ;;  %v773_v25 = vsel %vm1692_vm3, %v771_v22, 0.0  ;;  %v809_v26 = vrot.slane %v802_v23, %v1681_v29  ;;  %v842_v30 = vpop.permute.xlu1 %841  ;;  %v931_v23 = vmul.f32 %v1619_v15, %v1764_v49 }
  0xea   : > { %v778_v31 = vrot.slane %v773_v25, %v1573_v5  ;;  %v782_v32 = vrot.slane %v773_v25, %v1565_v4  ;;  %v843_v33 = vsel %vm378_vm5, %v842_v30, %v839_v58  ;;  %v845_v34 = vsel %vm378_vm5, %v839_v58, %v842_v30 }
  0xeb   : > { %v816_v39 = vrot.slane %v809_v26, %v1681_v29  ;;  %v847_v40 = vcombine.low %v845_v34, %v843_v33 }
  0xec   : > { %v785_v41 = vmul.f32 %v778_v31, %v1697_v37  ;;  %v786_v42 = vmul.f32 %v782_v32, %v1697_v37  ;;  %v787_v35 = vmul.f32 %v778_v31, %v1705_v43  ;;  %v788_v44 = vmul.f32 %v782_v32, %v1705_v43 }
  0xed   : > { %v939_v24 = vpop.permute.xlu0 %938  ;;  %v818_v46 = vsel %vm245_vm1, %v816_v39, 0.0  ;;  %v854_v47 = vrot.slane %v847_v40, %v1681_v29  ;;  %v887_v48 = vpop.permute.xlu1 %886  ;;  %v493_v43 = vmul.f32 %v1757_v38, %v1593_v10  ;;  %v1822_v10 = vmul.f32 %v1629_v17, %v1757_v38 }
  0xee   : > { %v823_v50 = vrot.slane %v818_v46, %v1573_v5  ;;  %v827_v51 = vrot.slane %v818_v46, %v1565_v4  ;;  %v888_v53 = vsel %vm432_vm8, %v887_v48, %v884_v3  ;;  %v890_v37 = vsel %vm432_vm8, %v884_v3, %v887_v48 }
  0xef   : > { %v861_v56 = vrot.slane %v854_v47, %v1681_v29  ;;  %v892_v57 = vcombine.low %v890_v37, %v888_v53  ;;  %v1836_v38 = vadd.f32 %v493_v43, %v1774_v61 }
  0xf0   : > { %v830_v58 = vmul.f32 %v823_v50, %v1715_v54  ;;  %v831_v59 = vmul.f32 %v827_v51, %v1715_v54  ;;  %v832_v60 = vmul.f32 %v823_v50, %v1712_v52  ;;  %v833_v63 = vmul.f32 %v827_v51, %v1712_v52 }
  0xf1   : > { %v1800_v45 = vpop.permute.xlu0 %553  ;;  %v863_v3 = vsel %vm1737_vm7, %v861_v56, 0.0  ;;  %v899_v7 = vrot.slane %v892_v57, %v1681_v29  ;;  %v502_v54 = vpop.permute.xlu1 %501 }
  0xf2   : > { %v834_v9 = vadd.f32 %v830_v58, %v785_v41  ;;  %v835_v11 = vadd.f32 %v831_v59, %v786_v42  ;;  %v836_v14 = vadd.f32 %v832_v60, %v787_v35  ;;  %v837_v52 = vadd.f32 %v833_v63, %v788_v44 }
  0xf3   : > { %v868_v18 = vrot.slane %v863_v3, %v1573_v5  ;;  %v872_v20 = vrot.slane %v863_v3, %v1565_v4  ;;  %v906_v21 = vrot.slane %v899_v7, %v1681_v29  ;;  %v504_v22 = vsel %vm503_vm9, %v500_v13, %v502_v54 }
  0xf4   : > { %v507_v25 = vsel %vm503_vm9, %v502_v54, %v500_v13 }
  0xf5   : > { %v1818_v6 = vpop.permute.xlu0 %983  ;;  %v875_v30 = vmul.f32 %v868_v18, %v1727_v2  ;;  %v876_v31 = vmul.f32 %v872_v20, %v1727_v2  ;;  %v877_v32 = vmul.f32 %v868_v18, %v1730_v12  ;;  %v878_v33 = vmul.f32 %v872_v20, %v1730_v12  ;;  %v941_v34 = vpop.permute.xlu1 %940 }
  0xf6   : > { %v908_v17 = vsel %vm246_vm2, %v906_v21, 0.0  ;;  %v509_v61 = vcombine.low %v504_v22, %v507_v25  ;;  %v942_v15 = vsel %vm503_vm9, %v939_v24, %v941_v34  ;;  %v945_v49 = vsel %vm503_vm9, %v941_v34, %v939_v24 }
  0xf7   : > { %v913_v13 = vrot.slane %v908_v17, %v1573_v5  ;;  %v917_v39 = vrot.slane %v908_v17, %v1565_v4  ;;  %v947_v2 = vcombine.low %v942_v15, %v945_v49  ;;  %v879_v40 = vadd.f32 %v875_v30, %v834_v9 }
  0xf8   : > { %v516_v41 = vrot.slane %v509_v61, %v1681_v29  ;;  %v880_v12 = vadd.f32 %v876_v31, %v835_v11  ;;  %v881_v35 = vadd.f32 %v877_v32, %v836_v14  ;;  %v882_v44 = vadd.f32 %v878_v33, %v837_v52 }
  0xf9   : > { %v528_v26 = vpop.permute.xlu0 %527  ;;  %v920_v46 = vmul.f32 %v913_v13, %v1742_v19  ;;  %v921_v47 = vmul.f32 %v917_v39, %v1742_v19  ;;  %v922_v48 = vmul.f32 %v913_v13, %v1755_v36  ;;  %v923_v24 = vmul.f32 %v917_v39, %v1755_v36  ;;  %v556_v50 = vpop.permute.xlu1 %555 }
  0xfa   : > { %v523_v51 = vrot.slane %v516_v41, %v1681_v29  ;;  %v954_v53 = vrot.slane %v947_v2, %v1681_v29  ;;  %v558_v37 = vsel %vm557_vm10, %v1800_v45, %v556_v50  ;;  %v561_v43 = vsel %vm557_vm10, %v556_v50, %v1800_v45 }
  0xfb   : > { %v924_v56 = vadd.f32 %v920_v46, %v879_v40  ;;  %v925_v57 = vadd.f32 %v921_v47, %v880_v12  ;;  %v563_v58 = vcombine.low %v558_v37, %v561_v43  ;;  %v926_v59 = vadd.f32 %v922_v48, %v881_v35 }
  0xfc   : > { %v498_v19 = vadd.f32 %v494_v55, %v1776_v62  ;;  %v961_v36 = vrot.slane %v954_v53, %v1681_v29  ;;  %v525_v60 = vsel %vm248_vm6, %v523_v51, 0.0  ;;  %v927_v63 = vadd.f32 %v923_v24, %v882_v44 }
  0xfd   : > { %v1855_v42 = vpop.permute.xlu0 %609  ;;  %v538_v3 = vrot.slane %v525_v60, %v1573_v5  ;;  %v542_v7 = vrot.slane %v525_v60, %v1565_v4  ;;  %v934_v54 = vadd.f32 %v930_v16, %v924_v56  ;;  %v935_v9 = vadd.f32 %v931_v23, %v925_v57  ;;  %v986_v45 = vpop.permute.xlu1 %985 }
  0xfe   : > { %v963_v11 = vsel %vm248_vm6, %v961_v36, 0.0  ;;  %v570_v14 = vrot.slane %v563_v58, %v1681_v29  ;;  %v987_v62 = vsel %vm557_vm10, %v1818_v6, %v986_v45  ;;  %v990_v55 = vsel %vm557_vm10, %v986_v45, %v1818_v6 }
  0xff   : > { %v545_v18 = vmul.f32 %v538_v3, %v528_v26  ;;  %v546_v20 = vmul.f32 %v542_v7, %v528_v26  ;;  %v968_v21 = vrot.slane %v963_v11, %v1573_v5  ;;  %v972_v22 = vrot.slane %v963_v11, %v1565_v4 }
 0x100   : > { %v577_v16 = vrot.slane %v570_v14, %v1681_v29  ;;  %v992_v23 = vcombine.low %v987_v62, %v990_v55  ;;  %v936_v25 = vadd.f32 %v1822_v10, %v926_v59  ;;  %v937_v30 = vadd.f32 %v1826_v8, %v927_v63 }
 0x101   : > { %v1031_v52 = vpop.permute.xlu0 %1030  ;;  %v549_v31 = vadd.f32 %v545_v18, %v1778_v0  ;;  %v550_v32 = vadd.f32 %v546_v20, %v1780_v1  ;;  %v975_v33 = vmul.f32 %v968_v21, %v528_v26  ;;  %v976_v34 = vmul.f32 %v972_v22, %v528_v26  ;;  %v532_v17 = vpop.permute.xlu1 %531 }
 0x102   : > { %v999_v61 = vrot.slane %v992_v23, %v1681_v29  ;;  %v547_v10 = vmul.f32 %v538_v3, %v532_v17  ;;  %v548_v15 = vmul.f32 %v542_v7, %v532_v17  ;;  %v977_v8 = vmul.f32 %v968_v21, %v532_v17 }
 0x103   : > { %v979_v49 = vadd.f32 %v975_v33, %v934_v54  ;;  %v980_v13 = vadd.f32 %v976_v34, %v935_v9  ;;  %v978_v39 = vmul.f32 %v972_v22, %v532_v17  ;;  %v579_v2 = vsel %vm1889_vm13, %v577_v16, 0.0 }
 0x104   : > { %v1006_v40 = vrot.slane %v999_v61, %v1681_v29  ;;  %v551_v0 = vadd.f32 %v547_v10, %v1836_v38  ;;  %v552_v41 = vadd.f32 %v548_v15, %v498_v19  ;;  %v981_v1 = vadd.f32 %v977_v8, %v936_v25 }
 0x105   : > { %v586_v12 = vpop.permute.xlu0 %585  ;;  %v982_v26 = vadd.f32 %v978_v39, %v937_v30  ;;  %v592_v35 = vrot.slane %v579_v2, %v1573_v5  ;;  %v596_v44 = vrot.slane %v579_v2, %v1565_v4  ;;  %v608_v46 = vpop.permute.xlu1 %607 }
 0x106   : > { %v1008_v47 = vsel %vm1889_vm13, %v1006_v40, 0.0  ;;  %v612_v48 = vsel %vm611_vm12, %v608_v46, %v1855_v42  ;;  %v615_v24 = vsel %vm611_vm12, %v1855_v42, %v608_v46 }
 0x107   : > { %v601_v50 = vmul.f32 %v592_v35, %v586_v12  ;;  %v602_v38 = vmul.f32 %v596_v44, %v586_v12  ;;  %v1013_v51 = vrot.slane %v1008_v47, %v1573_v5  ;;  %v1017_v53 = vrot.slane %v1008_v47, %v1565_v4 }
 0x108   : > { %v617_v37 = vcombine.low %v612_v48, %v615_v24 }
 0x109   : > { %v1910_v43 = vadd.f32 %v601_v50, %v551_v0  ;;  %v1912_v56 = vadd.f32 %v602_v38, %v552_v41  ;;  %v1022_v57 = vmul.f32 %v1013_v51, %v586_v12  ;;  %v1023_v58 = vmul.f32 %v1017_v53, %v586_v12  ;;  %v1029_v59 = vpop.permute.xlu1 %1028  ;;  %v1074_v60 = vpop.permute.xlu0 %1073 }
 0x10a   : > { %v624_v19 = vrot.slane %v617_v37, %v1681_v29  ;;  %v1032_v36 = vsel %vm611_vm12, %v1029_v59, %v1031_v52  ;;  %v1035_v42 = vsel %vm611_vm12, %v1031_v52, %v1029_v59 }
 0x10b   : > { %v1026_v63 = vadd.f32 %v1022_v57, %v981_v1  ;;  %v1027_v3 = vadd.f32 %v1023_v58, %v982_v26  ;;  %v1037_v7 = vcombine.low %v1032_v36, %v1035_v42 }
 0x10c   : > { %v631_v54 = vrot.slane %v624_v19, %v1681_v29 }
 0x10d   : > { %v1044_v9 = vrot.slane %v1037_v7, %v1681_v29  ;;  %v582_v45 = vpop.permute.xlu1 %581  ;;  %v636_v23 = vpop.permute.xlu0 %635 }
 0x10e   : > { %v599_v11 = vmul.f32 %v592_v35, %v582_v45  ;;  %v600_v14 = vmul.f32 %v596_v44, %v582_v45  ;;  %v1020_v62 = vmul.f32 %v1013_v51, %v582_v45  ;;  %v1021_v55 = vmul.f32 %v1017_v53, %v582_v45 }
 0x10f   : > { %v1051_v18 = vrot.slane %v1044_v9, %v1681_v29  ;;  %v633_v20 = vsel %vm250_vm11, %v631_v54, 0.0 }
 0x110   : > { %v603_v21 = vadd.f32 %v599_v11, %v549_v31  ;;  %v604_v52 = vadd.f32 %v600_v14, %v550_v32  ;;  %v1024_v22 = vadd.f32 %v1020_v62, %v979_v49  ;;  %v1025_v16 = vadd.f32 %v1021_v55, %v980_v13 }
 0x111   : > { %v646_v25 = vrot.slane %v633_v20, %v1573_v5  ;;  %v650_v30 = vrot.slane %v633_v20, %v1565_v4  ;;  %v1053_v6 = vsel %vm250_vm11, %v1051_v18, 0.0  ;;  %v662_v33 = vpop.permute.xlu1 %661 }
 0x112   : > { %v1058_v34 = vrot.slane %v1053_v6, %v1573_v5  ;;  %v1062_v17 = vrot.slane %v1053_v6, %v1565_v4  ;;  %v694_v28 = vpop.permute.xlu0 %693 }
 0x113   : > { %v653_v61 = vmul.f32 %v646_v25, %v636_v23  ;;  %v654_v10 = vmul.f32 %v650_v30, %v636_v23 }
 0x114   : > { %v1065_v31 = vmul.f32 %v1058_v34, %v636_v23  ;;  %v1066_v32 = vmul.f32 %v1062_v17, %v636_v23 }
 0x115   : > { %v657_v15 = vadd.f32 %v653_v61, %v603_v21  ;;  %v658_v8 = vadd.f32 %v654_v10, %v604_v52  ;;  %v664_v49 = vpop.permute.xlu1 %663 }
 0x116   : > { %v1069_v13 = vadd.f32 %v1065_v31, %v1024_v22  ;;  %v1070_v39 = vadd.f32 %v1066_v32, %v1025_v16  ;;  %v666_v2 = vsel %vm665_vm14, %v662_v33, %v664_v49  ;;  %v669_v40 = vsel %vm665_vm14, %v664_v49, %v662_v33 }
 0x117   : > { %v671_v0 = vcombine.low %v666_v2, %v669_v40 }
 0x119   : > { %v678_v41 = vrot.slane %v671_v0, %v1681_v29  ;;  %v1076_v1 = vpop.permute.xlu1 %1075 }
 0x11a   : > { %v1077_v12 = vsel %vm665_vm14, %v1074_v60, %v1076_v1  ;;  %v1080_v26 = vsel %vm665_vm14, %v1076_v1, %v1074_v60 }
 0x11b   : > { %v685_v44 = vrot.slane %v678_v41, %v1681_v29  ;;  %v1082_v46 = vcombine.low %v1077_v12, %v1080_v26 }
 0x11d   : > { %v1089_v47 = vrot.slane %v1082_v46, %v1681_v29  ;;  %v640_v48 = vpop.permute.xlu1 %639  ;;  %v687_v24 = vsel %vm1933_vm15, %v685_v44, 0.0 }
 0x11e   : > { %v655_v50 = vmul.f32 %v646_v25, %v640_v48  ;;  %v656_v38 = vmul.f32 %v650_v30, %v640_v48  ;;  %v1067_v51 = vmul.f32 %v1058_v34, %v640_v48  ;;  %v1068_v53 = vmul.f32 %v1062_v17, %v640_v48 }
 0x11f   : > { %v1096_v27 = vrot.slane %v1089_v47, %v1681_v29  ;;  %v700_v37 = vrot.slane %v687_v24, %v1573_v5  ;;  %v704_v57 = vrot.slane %v687_v24, %v1565_v4 }
 0x120   : > { %v659_v58 = vadd.f32 %v655_v50, %v1910_v43  ;;  %v660_v59 = vadd.f32 %v656_v38, %v1912_v56  ;;  %v1071_v19 = vadd.f32 %v1067_v51, %v1026_v63  ;;  %v1072_v36 = vadd.f32 %v1068_v53, %v1027_v3 }
 0x121   : > { %v709_v42 = vmul.f32 %v700_v37, %v694_v28  ;;  %v710_v60 = vmul.f32 %v704_v57, %v694_v28  ;;  %v1098_v7 = vsel %vm1933_vm15, %v1096_v27, 0.0 }
 0x122   : > { %v1103_v54 = vrot.slane %v1098_v7, %v1573_v5  ;;  %v1107_v29 = vrot.slane %v1098_v7, %v1565_v4  ;;  %v690_v9 = vpop.permute.xlu1 %689 }
 0x123   : > { %v707_v45 = vmul.f32 %v700_v37, %v690_v9  ;;  %v708_v11 = vmul.f32 %v704_v57, %v690_v9  ;;  %v713_v14 = vadd.f32 %v709_v42, %v659_v58  ;;  %v714_v43 = vadd.f32 %v710_v60, %v660_v59 }
 0x124   : > { %v1112_v62 = vmul.f32 %v1103_v54, %v694_v28  ;;  %v1113_v56 = vmul.f32 %v1107_v29, %v694_v28  ;;  %v1110_v63 = vmul.f32 %v1103_v54, %v690_v9  ;;  %v1111_v3 = vmul.f32 %v1107_v29, %v690_v9 }
 0x125   : > { %v711_v55 = vadd.f32 %v707_v45, %v657_v15  ;;  %v712_v18 = vadd.f32 %v708_v11, %v658_v8 }
 0x126   : > { %v1114_v20 = vadd.f32 %v1110_v63, %v1069_v13  ;;  %v1115_v21 = vadd.f32 %v1111_v3, %v1070_v39  ;;  %v1116_v5 = vadd.f32 %v1112_v62, %v1071_v19  ;;  %v1117_v52 = vadd.f32 %v1113_v56, %v1072_v36 }
 0x127   : > { %v718_v4 = vpop.permute.xlu1 %717 }
 0x128   : > { %v725_v22 = vadd.f32 %v718_v4, %v711_v55  ;;  %v726_v16 = vadd.f32 %v718_v4, %v712_v18  ;;  %v1118_v23 = vadd.f32 %v1114_v20, %v718_v4  ;;  %v1119_v25 = vadd.f32 %v1115_v21, %v718_v4 }
 0x12a   : > { %v729_v30 = vmax.f32 %v725_v22, 0.0  ;;  %v730_v6 = vmax.f32 %v726_v16, 0.0  ;;  %v1122_v33 = vmax.f32 %v1118_v23, 0.0  ;;  %v1123_v34 = vmax.f32 %v1119_v25, 0.0 }
 0x12b   : > { %v723_v17 = vpop.permute.xlu1 %722 }
 0x12c   : > { %733 = vst [vmem:[%s231_s14] sm:$0xff] %v729_v30  ;;  %734 = vst [vmem:[%s231_s14 + $0x8] sm:$0xff] %v730_v6  ;;  %v727_v61 = vadd.f32 %v723_v17, %v713_v14  ;;  %v728_v10 = vadd.f32 %v723_v17, %v714_v43  ;;  %v1120_v31 = vadd.f32 %v1116_v5, %v723_v17 }
 0x12d   : > { %1230 = vst [vmem:[%s231_s14 + $0x20] sm:$0xff] %v1122_v33  ;;  %1231 = vst [vmem:[%s231_s14 + $0x28] sm:$0xff] %v1123_v34  ;;  %v1121_v32 = vadd.f32 %v1117_v52, %v723_v17 }
 0x12e   : > { %v731_v15 = vmax.f32 %v727_v61, 0.0  ;;  %v732_v8 = vmax.f32 %v728_v10, 0.0  ;;  %v1124_v49 = vmax.f32 %v1120_v31, 0.0 }
 0x12f   : > { %v1125_v13 = vmax.f32 %v1121_v32, 0.0 }
 0x130   : > { %735 = vst [vmem:[%s231_s14 + $0x10] sm:$0xff] %v731_v15  ;;  %736 = vst [vmem:[%s231_s14 + $0x18] sm:$0xff] %v732_v8 }
 0x131   : > { %1232 = vst [vmem:[%s231_s14 + $0x30] sm:$0xff] %v1124_v49  ;;  %1233 = vst [vmem:[%s231_s14 + $0x38] sm:$0xff] %v1125_v13 }
 0x132   : > { %1371 = shalt.err (!%p1368_p7)
}
 0x133   : > { %s1372_s7 = scalar_lea.hbm %s1957_s23, 1024  ;;  %s1376_s10 = scalar_lea.hbm %s2010_s5, 2048 }
 0x134   : > { %p1373_p8 = scmp.ne.s32.totalorder %s1957_s23, %s1372_s7  ;;  %p1377_p1 = scmp.lt.u32.totalorder %s1957_s23, %s2010_s5 }
 0x135   : > { %p1378_p0 = scmp.lt.u32.totalorder %s1376_s10, %s1372_s7  ;;  %p1380_p6 = scmp.lt.u32.totalorder %s1372_s7, %s1957_s23 }
 0x136   : > { %p1374_p11 = pnand %p1373_p8, %p2029_p9 }
 0x137   : > { %p1379_p5 = por %p1378_p0, %p1377_p1 }
 0x138   : > { %p1375_p13 = pneg %p1374_p11 }
 0x139   : > { %p1381_p10 = por %p1380_p6, %p1379_p5 }
 0x13b   : > { %p1382_p12 = pnand %p1381_p10, %p1375_p13 }
 0x13d   : > { %1385 = shalt.err (!%p1382_p12)
}
 0x13e   : > { %s1446_s14 = smov 256  }
 0x13f   : > { %1246 = dma.vmem_to_hbm [thread:$0]  (%p2029_p9), %s1959_s15, 1024, %s1957_s23, %s1963_s22, %s1446_s14, %s1446_s14, %s1430_s13  }
 0x140 PF: > { %p1258_p2 = scmp.ge.s32.totalorder %s1424_s21, 2  ;;  %s1161_s16 = sand.u32 1, %s1412_s18  }
 0x141   : > { %p2030_p3 = scmp.ne.s32.totalorder %s2015_s29, 0  ;;  %s1162_s17 = scalar_lea.sflag [#allocation4], %s1161_s16 }
 0x143   : > { %p1253_p4 = pnand %p1258_p2, %p2030_p3 }
 0x145   : > { %1407 = dma.done.wait (!%p1253_p4), %s1162_s17, 1024  }
 0x146   : > { %1409 = vsyncadd (!%p1253_p4), %s1162_s17, 4294966272  ;;  %p16_p7 = scmp.ge.s32.totalorder %s1502_s24, 4   ;;  %s2031_s18 = smov %s1416_s19 }
 0x147   : > { %s2032_s19 = smov %s1420_s20  ;;  %s2033_s20 = smov %s1513_s27 }
 0x148   : > { %s2034_s21 = smov %s1502_s24  ;;  %18 = sbr.rel (!%p16_p7) target bundleno = 4 (0x4), region = 82 }
 0x14f   :  { %1167 = vsyncpa [#allocation3], 1 }
 0x150   :  { %1169 = vsyncpa [#allocation3 + $0x1], 1 }
 0x151   :  { %1170 = vsyncpa [#allocation4], 1 }
 0x152   :  { %1172 = vsyncpa [#allocation4 + $0x1], 1 }

</bundles_post_ra>
